<compile_context>
chip_gen: v7x
topology: tpu7x:2x2x1
jax: 0.10.0
libtpu: 0.0.40
codegen_flags: <defaults>
</compile_context>

<pallas_src>
from functools import partial

import jax
import jax.numpy as jnp
from jax.experimental import pallas as pl
from jax.experimental.pallas import tpu as pltpu


# --------------------------------------------------------------------------- #
# Fused matmul + BN-affine (+ residual) (+ ReLU) kernels
# --------------------------------------------------------------------------- #
def _mm_bn_act_kernel(x_ref, w_ref, sb_ref, o_ref, *, apply_relu):
    # x_ref: (TR, K), w_ref: (K, Cout), sb_ref: (2, Cout) = [scale; bias]
    acc = jnp.dot(x_ref[...], w_ref[...], preferred_element_type=jnp.float32)
    y = acc * sb_ref[0:1, :] + sb_ref[1:2, :]
    if apply_relu:
        y = jnp.maximum(y, 0.0)
    o_ref[...] = y.astype(o_ref.dtype)


def _mm_bn_res_act_kernel(x_ref, w_ref, sb_ref, r_ref, o_ref, *, apply_relu):
    # Same as above plus fused residual add (conv3 epilogue).
    acc = jnp.dot(x_ref[...], w_ref[...], preferred_element_type=jnp.float32)
    y = acc * sb_ref[0:1, :] + sb_ref[1:2, :] + r_ref[...].astype(jnp.float32)
    if apply_relu:
        y = jnp.maximum(y, 0.0)
    o_ref[...] = y.astype(o_ref.dtype)


def _row_tile(R, bytes_per_row, tile_rows):
    """Pick a row tile: multiple of 8 (f32 sublane), ~2 MiB working set."""
    if tile_rows is None:
        tr = (2 * 1024 * 1024) // max(bytes_per_row, 1)
        tr = (tr // 8) * 8
    else:
        tr = tile_rows
    if tr <= 0 or tr >= R or tr % 8 != 0 or R % 8 != 0:
        return R  # single full-extent block (always legal)
    return tr


def _fused_conv_mm(x2d, w, scale, bias, residual=None, apply_relu=True,
                   tile_rows=None):
    """y = act((x2d @ w) * scale + bias [+ residual]) via a row-tiled Pallas kernel.

    x2d: (R, K); w: (K, Cout); scale/bias: (Cout,); residual: (R, Cout) or None.
    """
    R, K = x2d.shape
    Kw, Cout = w.shape
    assert K == Kw
    sb = jnp.stack([scale, bias], axis=0).astype(jnp.float32)  # (2, Cout)

    bytes_per_row = 4 * (K + Cout * (2 if residual is not None else 1))
    tr = _row_tile(R, bytes_per_row, tile_rows)
    grid = (pl.cdiv(R, tr),)

    x_spec = pl.BlockSpec((tr, K), lambda i: (i, 0))
    w_spec = pl.BlockSpec((K, Cout), lambda i: (0, 0))
    sb_spec = pl.BlockSpec((2, Cout), lambda i: (0, 0))
    o_spec = pl.BlockSpec((tr, Cout), lambda i: (i, 0))

    if residual is None:
        kernel = partial(_mm_bn_act_kernel, apply_relu=apply_relu)
        in_specs = [x_spec, w_spec, sb_spec]
        args = (x2d, w, sb)
    else:
        kernel = partial(_mm_bn_res_act_kernel, apply_relu=apply_relu)
        in_specs = [x_spec, w_spec, sb_spec,
                    pl.BlockSpec((tr, Cout), lambda i: (i, 0))]
        args = (x2d, w, sb, residual)

    return pl.pallas_call(
        kernel,
        out_shape=jax.ShapeDtypeStruct((R, Cout), x2d.dtype),
        grid_spec=pltpu.PrefetchScalarGridSpec(
            num_scalar_prefetch=0,
            grid=grid,
            in_specs=in_specs,
            out_specs=o_spec,
        ),
        compiler_params=pltpu.CompilerParams(
            dimension_semantics=("parallel",),
        ),
    )(*args)


# --------------------------------------------------------------------------- #
# Layout helpers (pure plumbing, outside the kernels)
# --------------------------------------------------------------------------- #
def _im2col_3x3(x_nhwc, stride):
    """3x3, padding=1 patches. Returns ((N*Ho*Wo, 9*C), Ho, Wo)."""
    N, H, W, C = x_nhwc.shape
    Ho = (H + 2 - 3) // stride + 1
    Wo = (W + 2 - 3) // stride + 1
    xp = jnp.pad(x_nhwc, ((0, 0), (1, 1), (1, 1), (0, 0)))
    cols = []
    for di in range(3):
        for dj in range(3):
            sl = xp[:, di: di + (Ho - 1) * stride + 1: stride,
                       dj: dj + (Wo - 1) * stride + 1: stride, :]
            cols.append(sl)
    patches = jnp.concatenate(cols, axis=-1)          # (N, Ho, Wo, 9*C)
    return patches.reshape(N * Ho * Wo, 9 * C), Ho, Wo


def fold_bn(gamma, beta, mean, var, eps=1e-5):
    """Eval-mode BatchNorm folded to per-channel scale/bias."""
    s = gamma / jnp.sqrt(var + eps)
    return s, beta - mean * s


# --------------------------------------------------------------------------- #
# Bottleneck forward
# --------------------------------------------------------------------------- #
def bottleneck_forward(x, params, stride=1, last_relu=True, tile_rows=None):
    """PyTorch Bottleneck.forward (eval mode), NCHW in / NCHW out.

    params: conv weights in PyTorch (Cout, Cin, kh, kw) layout + folded BN
    scale/bias; optional 'w_ds'/'bn_ds_*' for the standard conv1x1+BN downsample.
    """
    N, Cin, H, W = x.shape
    w1, w2, w3 = params["w1"], params["w2"], params["w3"]
    planes = w1.shape[0]
    cout = w3.shape[0]

    # One layout change at entry; everything below stays channels-last.
    x_nhwc = jnp.transpose(x, (0, 2, 3, 1))

    # conv1 (1x1) + bn1 + relu
    x_rows = x_nhwc.reshape(N * H * W, Cin)
    w1_mm = jnp.transpose(w1.reshape(planes, Cin))                 # (Cin, planes)
    h1 = _fused_conv_mm(x_rows, w1_mm, params["bn1_scale"], params["bn1_bias"],
                        apply_relu=True, tile_rows=tile_rows)
    h1_nhwc = h1.reshape(N, H, W, planes)

    # conv2 (3x3, stride, pad=1) + bn2 + relu
    patches, Ho, Wo = _im2col_3x3(h1_nhwc, stride)
    w2_mm = jnp.transpose(w2, (2, 3, 1, 0)).reshape(9 * planes, planes)
    h2 = _fused_conv_mm(patches, w2_mm, params["bn2_scale"], params["bn2_bias"],
                        apply_relu=True, tile_rows=tile_rows)

    # identity branch
    if "w_ds" in params:
        xs = x_nhwc[:, ::stride, ::stride, :][:, :Ho, :Wo, :]
        ident = _fused_conv_mm(
            xs.reshape(N * Ho * Wo, Cin),
            jnp.transpose(params["w_ds"].reshape(cout, Cin)),
            params["bn_ds_scale"], params["bn_ds_bias"],
            apply_relu=False, tile_rows=tile_rows)
    else:
        # stride == 1 and Cin == planes * expansion
        ident = x_nhwc.reshape(N * H * W, Cin)

    # conv3 (1x1) + bn3 + residual add (+ optional final relu), fully fused
    w3_mm = jnp.transpose(w3.reshape(cout, planes))                # (planes, cout)
    out = _fused_conv_mm(h2, w3_mm, params["bn3_scale"], params["bn3_bias"],
                         residual=ident, apply_relu=last_relu,
                         tile_rows=tile_rows)

    return jnp.transpose(out.reshape(N, Ho, Wo, cout), (0, 3, 1, 2))


# --------------------------------------------------------------------------- #
# Pure-JAX reference (lax.conv) for verification
# --------------------------------------------------------------------------- #
def _ref_bottleneck(x, params, stride, last_relu):
    def conv(x, w, stride=1, padding=0):
        return jax.lax.conv_general_dilated(
            x, w, window_strides=(stride, stride),
            padding=((padding, padding), (padding, padding)),
            dimension_numbers=("NCHW", "OIHW", "NCHW"))

    def bn(x, s, b):
        return x * s.reshape(1, -1, 1, 1) + b.reshape(1, -1, 1, 1)

    out = jax.nn.relu(bn(conv(x, params["w1"]),
                         params["bn1_scale"], params["bn1_bias"]))
    out = jax.nn.relu(bn(conv(out, params["w2"], stride=stride, padding=1),
                         params["bn2_scale"], params["bn2_bias"]))
    out = bn(conv(out, params["w3"]), params["bn3_scale"], params["bn3_bias"])
    if "w_ds" in params:
        ident = bn(conv(x, params["w_ds"], stride=stride),
                   params["bn_ds_scale"], params["bn_ds_bias"])
    else:
        ident = x
    out = out + ident
    if last_relu:
        out = jax.nn.relu(out)
    return out


# --------------------------------------------------------------------------- #
# Main
# --------------------------------------------------------------------------- #
if __name__ == "__main__":
    key = jax.random.PRNGKey(0)
    k_x1, k_p1, k_x2, k_p2 = jax.random.split(key, 4)

    def make_params(k, inplanes, planes, expansion=4, downsample=False):
        cout = planes * expansion
        ks = jax.random.split(k, 8)

        def conv_w(kk, co, ci, kh, kw):
            fan_in = ci * kh * kw
            return (jax.random.normal(kk, (co, ci, kh, kw), jnp.float32)
                    / jnp.sqrt(float(fan_in)))

        def bn_params(kk, c):
            k1, k2, k3, k4 = jax.random.split(kk, 4)
            gamma = 1.0 + 0.1 * jax.random.normal(k1, (c,), jnp.float32)
            beta = 0.1 * jax.random.normal(k2, (c,), jnp.float32)
            mean = 0.1 * jax.random.normal(k3, (c,), jnp.float32)
            var = jax.random.uniform(k4, (c,), jnp.float32, 0.5, 1.5)
            return fold_bn(gamma, beta, mean, var)

        p = {"w1": conv_w(ks[0], planes, inplanes, 1, 1),
             "w2": conv_w(ks[2], planes, planes, 3, 3),
             "w3": conv_w(ks[4], cout, planes, 1, 1)}
        p["bn1_scale"], p["bn1_bias"] = bn_params(ks[1], planes)
        p["bn2_scale"], p["bn2_bias"] = bn_params(ks[3], planes)
        p["bn3_scale"], p["bn3_bias"] = bn_params(ks[5], cout)
        if downsample:
            p["w_ds"] = conv_w(ks[6], cout, inplanes, 1, 1)
            p["bn_ds_scale"], p["bn_ds_bias"] = bn_params(ks[7], cout)
        return p

    # Test 1: identity shortcut (stride=1, no downsample), last_relu=True.
    N, inplanes, planes, H, W = 2, 16, 4, 16, 16
    x1 = jax.random.normal(k_x1, (N, inplanes, H, W), jnp.float32)
    p1 = make_params(k_p1, inplanes, planes, downsample=False)
    y1 = bottleneck_forward(x1, p1, stride=1, last_relu=True, tile_rows=128)
    y1 = jax.block_until_ready(y1)
    ref1 = _ref_bottleneck(x1, p1, stride=1, last_relu=True)
    assert y1.shape == ref1.shape == (N, planes * 4, H, W)
    assert jnp.allclose(y1, ref1, atol=3e-2, rtol=3e-2), "test 1 mismatch"

    # Test 2: strided block with conv1x1+BN downsample, last_relu=False.
    inplanes2, planes2, stride2 = 8, 4, 2
    x2 = jax.random.normal(k_x2, (N, inplanes2, H, W), jnp.float32)
    p2 = make_params(k_p2, inplanes2, planes2, downsample=True)
    y2 = bottleneck_forward(x2, p2, stride=stride2, last_relu=False,
                            tile_rows=64)
    y2 = jax.block_until_ready(y2)
    ref2 = _ref_bottleneck(x2, p2, stride=stride2, last_relu=False)
    assert y2.shape == ref2.shape == (N, planes2 * 4, H // 2, W // 2)
    assert jnp.allclose(y2, ref2, atol=3e-2, rtol=3e-2), "test 2 mismatch"

    print("KERNEL_OK")
</pallas_src>

<mosaic_0001>
module attributes {stable_mosaic.version = 11 : i64} {
  func.func @_mm_bn_act_kernel(%arg0: i32, %arg1: memref<128x16xf32, #tpu.memory_space<vmem>>, %arg2: memref<16x4xf32, #tpu.memory_space<vmem>>, %arg3: memref<2x4xf32, #tpu.memory_space<vmem>>, %arg4: memref<128x4xf32, #tpu.memory_space<vmem>>) attributes {dimension_semantics = [#tpu.dimension_semantics<parallel>], iteration_bounds = array<i64: 4>, scalar_prefetch = 0 : i64, scratch_operands = 0 : i64, tpu.core_type = #tpu.core_type<tc>, window_params = [{transform_indices = @transform_0, window_bounds = array<i64: 128, 16>}, {pipeline_mode = #tpu.pipeline_mode<synchronous>, transform_indices = @transform_1, window_bounds = array<i64: 16, 4>}, {pipeline_mode = #tpu.pipeline_mode<synchronous>, transform_indices = @transform_2, window_bounds = array<i64: 2, 4>}, {transform_indices = @transform_3, window_bounds = array<i64: 128, 4>}]} {
    %c0 = arith.constant 0 : index
    %c0_0 = arith.constant 0 : index
    %0 = vector.load %arg1[%c0, %c0_0] : memref<128x16xf32, #tpu.memory_space<vmem>>, vector<128x16xf32>
    %c0_1 = arith.constant 0 : index
    %c0_2 = arith.constant 0 : index
    %1 = vector.load %arg2[%c0_1, %c0_2] : memref<16x4xf32, #tpu.memory_space<vmem>>, vector<16x4xf32>
    %cst = arith.constant dense<0.000000e+00> : vector<128x4xf32>
    %2 = tpu.matmul %0, %1, %cst {dimension_numbers = #tpu.dot_dimension_numbers<[1], [0], [0], [1], [0, 0, 1, 1], [], []>} : vector<128x16xf32>, vector<16x4xf32>, vector<128x4xf32> -> vector<128x4xf32>
    %c0_3 = arith.constant 0 : index
    %c0_4 = arith.constant 0 : index
    %3 = vector.load %arg3[%c0_3, %c0_4] : memref<2x4xf32, #tpu.memory_space<vmem>>, vector<1x4xf32>
    %4 = vector.broadcast %3 : vector<1x4xf32> to vector<128x4xf32>
    %5 = arith.mulf %2, %4 : vector<128x4xf32>
    %c1 = arith.constant 1 : index
    %c0_5 = arith.constant 0 : index
    %6 = vector.load %arg3[%c1, %c0_5] : memref<2x4xf32, #tpu.memory_space<vmem>>, vector<1x4xf32>
    %7 = vector.broadcast %6 : vector<1x4xf32> to vector<128x4xf32>
    %8 = arith.addf %5, %7 : vector<128x4xf32>
    %cst_6 = arith.constant 0.000000e+00 : f32
    %9 = vector.broadcast %cst_6 : f32 to vector<128x4xf32>
    %10 = arith.maximumf %8, %9 : vector<128x4xf32>
    %c0_7 = arith.constant 0 : index
    %c0_8 = arith.constant 0 : index
    %11 = vector.load %arg4[%c0_7, %c0_8] : memref<128x4xf32, #tpu.memory_space<vmem>>, vector<128x4xf32>
    tpu.vector_store %arg4[%c0_7, %c0_8], %10 {strides = array<i32>} : memref<128x4xf32, #tpu.memory_space<vmem>>, vector<128x4xf32>,
    return
  }
  func.func @transform_0(%arg0: i32) -> (i32, i32) {
    %c0_i32 = arith.constant 0 : i32
    %c0_i32_0 = arith.constant 0 : i32
    return %arg0, %c0_i32 : i32, i32
  }
  func.func @transform_1(%arg0: i32) -> (i32, i32) {
    %c0_i32 = arith.constant 0 : i32
    %c0_i32_0 = arith.constant 0 : i32
    %c0_i32_1 = arith.constant 0 : i32
    return %c0_i32, %c0_i32_0 : i32, i32
  }
  func.func @transform_2(%arg0: i32) -> (i32, i32) {
    %c0_i32 = arith.constant 0 : i32
    %c0_i32_0 = arith.constant 0 : i32
    %c0_i32_1 = arith.constant 0 : i32
    return %c0_i32, %c0_i32_0 : i32, i32
  }
  func.func @transform_3(%arg0: i32) -> (i32, i32) {
    %c0_i32 = arith.constant 0 : i32
    %c0_i32_0 = arith.constant 0 : i32
    return %arg0, %c0_i32 : i32, i32
  }
}

</mosaic_0001>

<bundles_post_ra>
// kernel: tpu_custom_call.1
= control target key start
LH: loop header
LB: loop body
LE: loop exit
PB: predicated region body
PF: predicated region fallthrough
CT: control target
= control target key end

     0   :  { %s634_s12 = smov 0   ;;  %s756_s0 = inlined_call_operand.vmem [shape: f32[512,16], index: 0, kind: input, shape index: {}]   ;;  %s757_s1 = inlined_call_operand.vmem [shape: f32[16,4], index: 1, kind: input, shape index: {}]   ;;  %s758_s2 = inlined_call_operand.vmem [shape: f32[2,4], index: 2, kind: input, shape index: {}]   ;;  %s759_s3 = inlined_call_operand.vmem [shape: f32[512,4], index: 3, kind: output, shape index: {}]  }
   0x1 LB: > { %s517_s13 = sadd.s32 4294967295, %s612_s12   ;;  %p521_p0 = scmp.ge.s32.totalorder %s612_s12, 1  ;;  %s612_s12 = sphi %s634_s12, %s13_s12  }
   0x2   : > { %p138_p1 = scmp.lt.s32.totalorder %s612_s12, 5 }
   0x4   : > { %p139_p2 = pnand %p521_p0, %p138_p1 }
   0x5   : > { %v190_v0 = vld [vmem:[%s757_s1] sm:$0xff] (!%p139_p2)  ;;  %v191_v1 = vld [vmem:[%s757_s1 + $0x8] sm:$0xff] (!%p139_p2)  ;;  %s522_s18 = sshll.u32 (!%p139_p2), %s517_s13, 4  ;;  %vm192_vm0 = vcmask (!%p139_p2), 130048   ;;  %vm444_vm1 = vcmask (!%p139_p2), 31744  }
   0x6   : > { %142 = sbr.rel (%p139_p2) target bundleno = 251 (0xfb), region = 32  ;;  %v592_v2 = vpack.c.bf16 (!%p139_p2), %v191_v1, %v190_v0  ;;  %p163_p3 = scmp.lt.s32.totalorder (!%p139_p2), %s522_s18, 63  ;;  %v675_v19 = vld [vmem:[%s758_s2] ss:$0 sm:$0xff] (!%p139_p2)  ;;  %v680_v21 = vld [vmem:[%s758_s2 + $0x1] ss:$0 sm:$0xff] (!%p139_p2) }
   0x8   : > { %593 = vmatprep.subr.bf16.mxu0 (!%p139_p2), %v592_v2  ;;  %596 = vmatprep.subr.bf16.mxu1 (!%p139_p2), %v592_v2 }
   0x9   : > { %595 = vmatpush3.bf16.msra.mxu0 (!%p139_p2), %v592_v2  ;;  %597 = vmatpush3.bf16.msra.mxu1 (!%p139_p2), %v592_v2 }
   0xd   : > { %s761_s18 = smov (!%p163_p3, %s522_s18), 63 }
   0xe   : > { %s523_s19 = sshll.u32 %s761_s18, 3 }
   0xf   : > { %s166_s22 = scalar_lea.vmem %s756_s0, %s523_s19  ;;  %s693_s29 = scalar_lea.vmem %s759_s3, %s523_s19 }
  0x10   : > { %v174_v3 = vld [vmem:[%s166_s22] sm:$0xff]  ;;  %v175_v5 = vld [vmem:[%s166_s22 + $0x8] sm:$0xff]  ;;  %v176_v7 = vld [vmem:[%s166_s22 + $0x10] sm:$0xff] }
  0x11   : > { %v182_v4 = vld [vmem:[%s166_s22 + $0x40] sm:$0xff]  ;;  %568 = vmatprep.mubr.msk.f32.mxu0 %vm192_vm0, %v174_v3  ;;  %v183_v6 = vld [vmem:[%s166_s22 + $0x48] sm:$0xff]  ;;  %v184_v8 = vld [vmem:[%s166_s22 + $0x50] sm:$0xff] }
  0x12   : > { %580 = vmatprep.mubr.msk.f32.mxu1 %vm192_vm0, %v182_v4  ;;  %569 = vmatmul.mubr.msk.f32.vlgmr.msra.gmra.mrb[0].mxu0 %vm192_vm0, %v175_v5  ;;  %v177_v9 = vld [vmem:[%s166_s22 + $0x18] sm:$0xff]  ;;  %v178_v11 = vld [vmem:[%s166_s22 + $0x20] sm:$0xff]  ;;  %v179_v13 = vld [vmem:[%s166_s22 + $0x28] sm:$0xff] }
  0x13   : > { %581 = vmatmul.mubr.msk.f32.vlgmr.msra.gmra.mrb[0].mxu1 %vm192_vm0, %v183_v6  ;;  %571 = vmatprep.mubr.msk.f32.mxu0 %vm192_vm0, %v176_v7  ;;  %v185_v10 = vld [vmem:[%s166_s22 + $0x58] sm:$0xff]  ;;  %v186_v12 = vld [vmem:[%s166_s22 + $0x60] sm:$0xff]  ;;  %v187_v14 = vld [vmem:[%s166_s22 + $0x68] sm:$0xff] }
  0x14   : > { %583 = vmatprep.mubr.msk.f32.mxu1 %vm192_vm0, %v184_v8  ;;  %v180_v15 = vld [vmem:[%s166_s22 + $0x30] sm:$0xff]  ;;  %v181_v17 = vld [vmem:[%s166_s22 + $0x38] sm:$0xff] }
  0x15   : > { %v188_v16 = vld [vmem:[%s166_s22 + $0x70] sm:$0xff]  ;;  %v189_v18 = vld [vmem:[%s166_s22 + $0x78] sm:$0xff] }
  0x16   : > { %572 = vmatmul.mubr.msk.f32.gmra.mrb[2].mxu0 %vm192_vm0, %v177_v9 }
  0x17   : > { %584 = vmatmul.mubr.msk.f32.gmra.mrb[2].mxu1 %vm192_vm0, %v185_v10  ;;  %574 = vmatprep.mubr.msk.f32.mxu0 %vm192_vm0, %v178_v11 }
  0x18   : > { %586 = vmatprep.mubr.msk.f32.mxu1 %vm192_vm0, %v186_v12 }
  0x1a   : > { %575 = vmatmul.mubr.msk.f32.gmra.mrb[4].mxu0 %vm192_vm0, %v179_v13 }
  0x1b   : > { %587 = vmatmul.mubr.msk.f32.gmra.mrb[4].mxu1 %vm192_vm0, %v187_v14  ;;  %577 = vmatprep.mubr.msk.f32.mxu0 %vm192_vm0, %v180_v15 }
  0x1c   : > { %589 = vmatprep.mubr.msk.f32.mxu1 %vm192_vm0, %v188_v16 }
  0x1e   : > { %578 = vmatmul.mubr.msk.f32.gmra.mrb[6].mxu0 %vm192_vm0, %v181_v17 }
  0x1f   : > { %590 = vmatmul.mubr.msk.f32.gmra.mrb[6].mxu1 %vm192_vm0, %v189_v18 }
  0xe5   : > { %v570_v20 = vpop.f32.mrb[0].mxu0 }
  0xe6   : > { %v582_v22 = vpop.f32.mrb[0].mxu1  ;;  %v392_v23 = vmul.f32 %v570_v20, %v675_v19  ;;  %v307_v25 = vpop.f32.mrb[1].mxu0 }
  0xe7   : > { %v400_v24 = vmul.f32 %v582_v22, %v675_v19  ;;  %v347_v26 = vpop.f32.mrb[1].mxu1  ;;  %v391_v27 = vmul.f32 %v675_v19, %v307_v25 }
  0xe8   : > { %v399_v28 = vmul.f32 %v675_v19, %v347_v26  ;;  %v413_v29 = vadd.f32 %v680_v21, %v392_v23 }
  0xe9   : > { %v421_v30 = vadd.f32 %v680_v21, %v400_v24  ;;  %v412_v31 = vadd.f32 %v680_v21, %v391_v27  ;;  %v573_v33 = vpop.f32.mrb[2].mxu0 }
  0xea   : > { %v420_v32 = vadd.f32 %v680_v21, %v399_v28  ;;  %v585_v34 = vpop.f32.mrb[2].mxu1  ;;  %v429_v35 = vmax.f32 %v413_v29, 0.0  ;;  %v394_v37 = vmul.f32 %v573_v33, %v675_v19  ;;  %v317_v39 = vpop.f32.mrb[3].mxu0 }
  0xeb   : > { %v437_v36 = vmax.f32 %v421_v30, 0.0  ;;  %v402_v38 = vmul.f32 %v585_v34, %v675_v19  ;;  %v357_v40 = vpop.f32.mrb[3].mxu1  ;;  %v428_v41 = vmax.f32 %v412_v31, 0.0  ;;  %v393_v43 = vmul.f32 %v675_v19, %v317_v39 }
  0xec   : > { %v436_v42 = vmax.f32 %v420_v32, 0.0  ;;  %v401_v44 = vmul.f32 %v675_v19, %v357_v40  ;;  %446 = vst.msk [vmem:[%s693_s29 + $0x8] sm:$0xff] %vm444_vm1, %v429_v35  ;;  %v415_v45 = vadd.f32 %v680_v21, %v394_v37 }
  0xed   : > { %454 = vst.msk [vmem:[%s693_s29 + $0x48] sm:$0xff] %vm444_vm1, %v437_v36  ;;  %v423_v46 = vadd.f32 %v680_v21, %v402_v38  ;;  %445 = vst.msk [vmem:[%s693_s29] sm:$0xff] %vm444_vm1, %v428_v41  ;;  %v414_v47 = vadd.f32 %v680_v21, %v393_v43  ;;  %v576_v49 = vpop.f32.mrb[4].mxu0 }
  0xee   : > { %453 = vst.msk [vmem:[%s693_s29 + $0x40] sm:$0xff] %vm444_vm1, %v436_v42  ;;  %v422_v48 = vadd.f32 %v680_v21, %v401_v44  ;;  %v588_v50 = vpop.f32.mrb[4].mxu1  ;;  %v431_v51 = vmax.f32 %v415_v45, 0.0  ;;  %v396_v53 = vmul.f32 %v576_v49, %v675_v19  ;;  %v327_v55 = vpop.f32.mrb[5].mxu0 }
  0xef   : > { %v439_v52 = vmax.f32 %v423_v46, 0.0  ;;  %v404_v54 = vmul.f32 %v588_v50, %v675_v19  ;;  %v367_v56 = vpop.f32.mrb[5].mxu1  ;;  %v430_v57 = vmax.f32 %v414_v47, 0.0  ;;  %v395_v59 = vmul.f32 %v675_v19, %v327_v55 }
  0xf0   : > { %v438_v58 = vmax.f32 %v422_v48, 0.0  ;;  %v403_v60 = vmul.f32 %v675_v19, %v367_v56  ;;  %448 = vst.msk [vmem:[%s693_s29 + $0x18] sm:$0xff] %vm444_vm1, %v431_v51  ;;  %v417_v61 = vadd.f32 %v680_v21, %v396_v53 }
  0xf1   : > { %456 = vst.msk [vmem:[%s693_s29 + $0x58] sm:$0xff] %vm444_vm1, %v439_v52  ;;  %v425_v62 = vadd.f32 %v680_v21, %v404_v54  ;;  %447 = vst.msk [vmem:[%s693_s29 + $0x10] sm:$0xff] %vm444_vm1, %v430_v57  ;;  %v416_v63 = vadd.f32 %v680_v21, %v395_v59  ;;  %v579_v1 = vpop.f32.mrb[6].mxu0 }
  0xf2   : > { %455 = vst.msk [vmem:[%s693_s29 + $0x50] sm:$0xff] %vm444_vm1, %v438_v58  ;;  %v424_v0 = vadd.f32 %v680_v21, %v403_v60  ;;  %v591_v2 = vpop.f32.mrb[6].mxu1  ;;  %v433_v3 = vmax.f32 %v417_v61, 0.0  ;;  %v398_v5 = vmul.f32 %v579_v1, %v675_v19  ;;  %v337_v7 = vpop.f32.mrb[7].mxu0 }
  0xf3   : > { %v441_v4 = vmax.f32 %v425_v62, 0.0  ;;  %v406_v6 = vmul.f32 %v591_v2, %v675_v19  ;;  %v377_v8 = vpop.f32.mrb[7].mxu1  ;;  %v432_v9 = vmax.f32 %v416_v63, 0.0  ;;  %v397_v11 = vmul.f32 %v675_v19, %v337_v7 }
  0xf4   : > { %v440_v10 = vmax.f32 %v424_v0, 0.0  ;;  %v405_v12 = vmul.f32 %v675_v19, %v377_v8  ;;  %450 = vst.msk [vmem:[%s693_s29 + $0x28] sm:$0xff] %vm444_vm1, %v433_v3  ;;  %v419_v13 = vadd.f32 %v680_v21, %v398_v5 }
  0xf5   : > { %458 = vst.msk [vmem:[%s693_s29 + $0x68] sm:$0xff] %vm444_vm1, %v441_v4  ;;  %v427_v14 = vadd.f32 %v680_v21, %v406_v6  ;;  %449 = vst.msk [vmem:[%s693_s29 + $0x20] sm:$0xff] %vm444_vm1, %v432_v9  ;;  %v418_v15 = vadd.f32 %v680_v21, %v397_v11 }
  0xf6   : > { %457 = vst.msk [vmem:[%s693_s29 + $0x60] sm:$0xff] %vm444_vm1, %v440_v10  ;;  %v426_v16 = vadd.f32 %v680_v21, %v405_v12  ;;  %v435_v17 = vmax.f32 %v419_v13, 0.0 }
  0xf7   : > { %v443_v18 = vmax.f32 %v427_v14, 0.0  ;;  %v434_v19 = vmax.f32 %v418_v15, 0.0 }
  0xf8   : > { %v442_v20 = vmax.f32 %v426_v16, 0.0  ;;  %452 = vst.msk [vmem:[%s693_s29 + $0x38] sm:$0xff] %vm444_vm1, %v435_v17 }
  0xf9   : > { %460 = vst.msk [vmem:[%s693_s29 + $0x78] sm:$0xff] %vm444_vm1, %v443_v18  ;;  %451 = vst.msk [vmem:[%s693_s29 + $0x30] sm:$0xff] %vm444_vm1, %v434_v19 }
  0xfa   : > { %459 = vst.msk [vmem:[%s693_s29 + $0x70] sm:$0xff] %vm444_vm1, %v442_v20 }
  0xfb PF: > { %s13_s12 = sadd.s32 1, %s612_s12  }
  0xfc   : > { %p10_p4 = scmp.ge.s32.totalorder %s13_s12, 6  }
  0xfe   :  { %12 = sbr.rel (!%p10_p4) target bundleno = 1 (0x1), region = 62 }

</bundles_post_ra>
